<compile_context>
chip_gen: v7x
topology: tpu7x:2x2x1
jax: 0.10.0
libtpu: 0.0.40
codegen_flags: <defaults>
</compile_context>

<pallas_src>
import functools

import jax
import jax.numpy as jnp
from jax import lax
from jax.experimental import pallas as pl
from jax.experimental.pallas import tpu as pltpu


def _self_attention_kernel(xq_ref, xkv_ref, wqT_ref, wkvT_ref, wuT_ref, bu_ref,
                           o_ref, kv_ref, attn_ref, *, heads):
    x_q = xq_ref[...]                         # (TQ, E) f32
    tq, e = x_q.shape
    s = e // heads

    # --- K/V projection for the whole sequence, once per batch element ------
    @pl.when(pl.program_id(1) == 0)
    def _():
        kv_ref[...] = jnp.dot(xkv_ref[...], wkvT_ref[...],
                              preferred_element_type=jnp.float32)   # (T, 2E)

    # --- Q projection (e^-0.25 scale already folded into wqT / wkT) ---------
    q = jnp.dot(x_q, wqT_ref[...], preferred_element_type=jnp.float32)  # (TQ, E)
    kv = kv_ref[...]
    k = kv[:, :e]                              # (T, E), already scaled
    v = kv[:, e:]                              # (T, E)

    # Contract the per-head feature dim directly: no explicit kh.T transpose.
    dn = (((1,), (1,)), ((), ()))

    # Static head loop with static lane slices; each head's context is written
    # straight into the attn scratch slice (no jnp.concatenate).
    for h in range(heads):
        lo, hi = h * s, (h + 1) * s
        qh = q[:, lo:hi]                       # (TQ, S)
        kh = k[:, lo:hi]                       # (T,  S)
        vh = v[:, lo:hi]                       # (T,  S)

        scores = lax.dot_general(qh, kh, dn,
                                 preferred_element_type=jnp.float32)  # (TQ, T)
        scores = scores - jnp.max(scores, axis=-1, keepdims=True)
        p = jnp.exp(scores)
        denom = jnp.sum(p, axis=-1, keepdims=True)
        p = p * pl.reciprocal(denom, approx=True)   # softmax over keys (dim=2)

        attn_ref[:, lo:hi] = jnp.dot(p, vh, preferred_element_type=jnp.float32)

    # --- unify heads: one wide matmul + bias ---------------------------------
    o_ref[...] = (jnp.dot(attn_ref[...], wuT_ref[...],
                          preferred_element_type=jnp.float32) + bu_ref[...])


def prepare_params(params, *, heads):
    """One-time host-side weight prep (keep OUT of the per-call hot path)."""
    E = params["wq"].shape[0]
    assert E % heads == 0
    scale = float(E) ** -0.25                 # q and k are each scaled by e^(1/4)
    wqT = (params["wq"].T * scale).astype(jnp.float32)          # (E, E)
    wkT = (params["wk"].T * scale).astype(jnp.float32)          # (E, E)
    wvT = params["wv"].T.astype(jnp.float32)                    # (E, E)
    return {
        "wqT": wqT,
        "wkvT": jnp.concatenate([wkT, wvT], axis=1),            # (E, 2E) fused
        "wuT": params["wu"].T.astype(jnp.float32),              # (E, E)
        "bu": params["bu"].reshape(1, E).astype(jnp.float32),   # (1, E)
    }


def self_attention(x, prepped, *, heads, q_tile=None):
    """x: (B, T, E) float32. prepped: output of prepare_params()."""
    B, T, E = x.shape
    assert E % heads == 0

    if q_tile is None:
        q_tile = T if (T <= 128 or T % 128 != 0) else 128
    assert T % q_tile == 0
    num_q_tiles = T // q_tile

    def full_spec(shape):
        return pl.BlockSpec(shape, lambda b, qi, _n=len(shape): (0,) * _n)

    in_specs = [
        pl.BlockSpec((None, q_tile, E), lambda b, qi: (b, qi, 0)),  # x (queries)
        pl.BlockSpec((None, T, E), lambda b, qi: (b, 0, 0)),        # x (keys/values)
        full_spec((E, E)),          # wqT (pre-scaled)
        full_spec((E, 2 * E)),      # wkvT (pre-scaled k | v)
        full_spec((E, E)),          # wuT
        full_spec((1, E)),          # bu
    ]
    out_specs = pl.BlockSpec((None, q_tile, E), lambda b, qi: (b, qi, 0))
    scratch_shapes = [
        pltpu.VMEM((T, 2 * E), jnp.float32),      # K|V for the full sequence
        pltpu.VMEM((q_tile, E), jnp.float32),     # per-head context slab
    ]

    # Advisory cost hint so XLA schedules surrounding work around this call.
    flops = (2 * B * T * E * (3 * E)      # q/k/v projections
             + 4 * B * T * T * E          # scores + context
             + 2 * B * T * E * E)         # unify heads
    bytes_accessed = 4 * (2 * B * T * E            # x read for q and for k/v
                          + 4 * E * E + E          # weights + bias
                          + B * T * E)             # output
    cost = pl.CostEstimate(flops=flops,
                           transcendentals=B * heads * T * T,
                           bytes_accessed=bytes_accessed)

    kernel = functools.partial(_self_attention_kernel, heads=heads)
    return pl.pallas_call(
        kernel,
        out_shape=jax.ShapeDtypeStruct((B, T, E), jnp.float32),
        grid=(B, num_q_tiles),
        in_specs=in_specs,
        out_specs=out_specs,
        scratch_shapes=scratch_shapes,
        compiler_params=pltpu.CompilerParams(
            dimension_semantics=("parallel", "arbitrary")),
        cost_estimate=cost,
    )(x, x, prepped["wqT"], prepped["wkvT"], prepped["wuT"], prepped["bu"])


def init_params(key, emb):
    ks = jax.random.split(key, 5)
    std = 0.1
    return {
        "wq": jax.random.normal(ks[0], (emb, emb), jnp.float32) * std,
        "wk": jax.random.normal(ks[1], (emb, emb), jnp.float32) * std,
        "wv": jax.random.normal(ks[2], (emb, emb), jnp.float32) * std,
        "wu": jax.random.normal(ks[3], (emb, emb), jnp.float32) * std,
        "bu": jax.random.normal(ks[4], (emb,), jnp.float32) * std,
    }


def reference_self_attention(x, p, heads):
    """Pure-JAX mirror of the PyTorch SelfAttention forward."""
    B, T, E = x.shape
    s = E // heads
    q = (x @ p["wq"].T) / E ** 0.25
    k = (x @ p["wk"].T) / E ** 0.25
    v = x @ p["wv"].T
    q = q.reshape(B, T, heads, s).transpose(0, 2, 1, 3)
    k = k.reshape(B, T, heads, s).transpose(0, 2, 1, 3)
    v = v.reshape(B, T, heads, s).transpose(0, 2, 1, 3)
    dot = jax.nn.softmax(jnp.einsum("bhts,bhks->bhtk", q, k), axis=-1)
    out = jnp.einsum("bhtk,bhks->bhts", dot, v).transpose(0, 2, 1, 3).reshape(B, T, E)
    return out @ p["wu"].T + p["bu"]


if __name__ == "__main__":
    B, T, E, H = 2, 8, 32, 4
    key = jax.random.PRNGKey(0)
    kx, kp = jax.random.split(key)
    x = jax.random.normal(kx, (B, T, E), jnp.float32)
    params = init_params(kp, E)

    prepped = prepare_params(params, heads=H)          # one-time weight prep
    out = self_attention(x, prepped, heads=H)
    out = jax.block_until_ready(out)

    ref = reference_self_attention(x, params, H)
    assert out.shape == (B, T, E)
    max_err = float(jnp.max(jnp.abs(out - ref)))
    assert jnp.allclose(out, ref, atol=5e-3, rtol=5e-3), max_err
    print("KERNEL_OK")
</pallas_src>

<mosaic_0001>
module attributes {stable_mosaic.version = 11 : i64} {
  func.func @_self_attention_kernel(%arg0: i32, %arg1: i32, %arg2: memref<1x8x32xf32, #tpu.memory_space<vmem>>, %arg3: memref<1x8x32xf32, #tpu.memory_space<vmem>>, %arg4: memref<32x32xf32, #tpu.memory_space<vmem>>, %arg5: memref<32x64xf32, #tpu.memory_space<vmem>>, %arg6: memref<32x32xf32, #tpu.memory_space<vmem>>, %arg7: memref<1x32xf32, #tpu.memory_space<vmem>>, %arg8: memref<1x8x32xf32, #tpu.memory_space<vmem>>, %arg9: memref<8x64xf32, #tpu.memory_space<vmem>>, %arg10: memref<8x32xf32, #tpu.memory_space<vmem>>) attributes {dimension_semantics = [#tpu.dimension_semantics<parallel>, #tpu.dimension_semantics<arbitrary>], iteration_bounds = array<i64: 2, 1>, scalar_prefetch = 0 : i64, scratch_operands = 2 : i64, tpu.core_type = #tpu.core_type<tc>, window_params = [{transform_indices = @transform_0, window_bounds = array<i64: 1, 8, 32>}, {transform_indices = @transform_1, window_bounds = array<i64: 1, 8, 32>}, {pipeline_mode = #tpu.pipeline_mode<synchronous>, transform_indices = @transform_2, window_bounds = array<i64: 32, 32>}, {pipeline_mode = #tpu.pipeline_mode<synchronous>, transform_indices = @transform_3, window_bounds = array<i64: 32, 64>}, {pipeline_mode = #tpu.pipeline_mode<synchronous>, transform_indices = @transform_4, window_bounds = array<i64: 32, 32>}, {pipeline_mode = #tpu.pipeline_mode<synchronous>, transform_indices = @transform_5, window_bounds = array<i64: 1, 32>}, {transform_indices = @transform_6, window_bounds = array<i64: 1, 8, 32>}]} {
    %c0 = arith.constant 0 : index
    %c0_0 = arith.constant 0 : index
    %c0_1 = arith.constant 0 : index
    %0 = vector.load %arg2[%c0, %c0_0, %c0_1] : memref<1x8x32xf32, #tpu.memory_space<vmem>>, vector<1x8x32xf32>
    %1 = vector.shape_cast %0 : vector<1x8x32xf32> to vector<8x32xf32>
    %c0_i32 = arith.constant 0 : i32
    %2 = arith.cmpi eq, %arg1, %c0_i32 : i32
    %3 = arith.extui %2 : i1 to i32
    %c0_i32_2 = arith.constant 0 : i32
    %4 = arith.cmpi ne, %3, %c0_i32_2 : i32
    scf.if %4 {
      %c0_38 = arith.constant 0 : index
      %c0_39 = arith.constant 0 : index
      %c0_40 = arith.constant 0 : index
      %83 = vector.load %arg3[%c0_38, %c0_39, %c0_40] : memref<1x8x32xf32, #tpu.memory_space<vmem>>, vector<1x8x32xf32>
      %84 = vector.shape_cast %83 : vector<1x8x32xf32> to vector<8x32xf32>
      %c0_41 = arith.constant 0 : index
      %c0_42 = arith.constant 0 : index
      %85 = vector.load %arg5[%c0_41, %c0_42] : memref<32x64xf32, #tpu.memory_space<vmem>>, vector<32x64xf32>
      %cst_43 = arith.constant dense<0.000000e+00> : vector<8x64xf32>
      %86 = tpu.matmul %84, %85, %cst_43 {dimension_numbers = #tpu.dot_dimension_numbers<[1], [0], [0], [1], [0, 0, 1, 1], [], []>} : vector<8x32xf32>, vector<32x64xf32>, vector<8x64xf32> -> vector<8x64xf32>
      %c0_44 = arith.constant 0 : index
      %c0_45 = arith.constant 0 : index
      %87 = vector.load %arg9[%c0_44, %c0_45] : memref<8x64xf32, #tpu.memory_space<vmem>>, vector<8x64xf32>
      tpu.vector_store %arg9[%c0_44, %c0_45], %86 {strides = array<i32>} : memref<8x64xf32, #tpu.memory_space<vmem>>, vector<8x64xf32>,
    } else {
    }
    %c0_3 = arith.constant 0 : index
    %c0_4 = arith.constant 0 : index
    %5 = vector.load %arg4[%c0_3, %c0_4] : memref<32x32xf32, #tpu.memory_space<vmem>>, vector<32x32xf32>
    %cst = arith.constant dense<0.000000e+00> : vector<8x32xf32>
    %6 = tpu.matmul %1, %5, %cst {dimension_numbers = #tpu.dot_dimension_numbers<[1], [0], [0], [1], [0, 0, 1, 1], [], []>} : vector<8x32xf32>, vector<32x32xf32>, vector<8x32xf32> -> vector<8x32xf32>
    %c0_5 = arith.constant 0 : index
    %c0_6 = arith.constant 0 : index
    %7 = vector.load %arg9[%c0_5, %c0_6] : memref<8x64xf32, #tpu.memory_space<vmem>>, vector<8x64xf32>
    %8 = vector.extract_strided_slice %7 {offsets = [0, 0], sizes = [8, 32], strides = [1, 1]} : vector<8x64xf32> to vector<8x32xf32>
    %9 = vector.extract_strided_slice %7 {offsets = [0, 32], sizes = [8, 32], strides = [1, 1]} : vector<8x64xf32> to vector<8x32xf32>
    %10 = vector.extract_strided_slice %6 {offsets = [0, 0], sizes = [8, 8], strides = [1, 1]} : vector<8x32xf32> to vector<8x8xf32>
    %11 = vector.extract_strided_slice %8 {offsets = [0, 0], sizes = [8, 8], strides = [1, 1]} : vector<8x32xf32> to vector<8x8xf32>
    %12 = vector.extract_strided_slice %9 {offsets = [0, 0], sizes = [8, 8], strides = [1, 1]} : vector<8x32xf32> to vector<8x8xf32>
    %cst_7 = arith.constant dense<0.000000e+00> : vector<8x8xf32>
    %13 = tpu.matmul %10, %11, %cst_7 {dimension_numbers = #tpu.dot_dimension_numbers<[1], [1], [0], [0], [0, 0, 1, 0], [], []>} : vector<8x8xf32>, vector<8x8xf32>, vector<8x8xf32> -> vector<8x8xf32>
    %cst_8 = arith.constant dense<0xFF800000> : vector<8xf32>
    %14 = vector.multi_reduction <maximumf>, %13, %cst_8 [1] : vector<8x8xf32> to vector<8xf32>
    %15 = vector.shape_cast %14 : vector<8xf32> to vector<8x1xf32>
    %16 = vector.broadcast %15 : vector<8x1xf32> to vector<8x8xf32>
    %17 = arith.subf %13, %16 : vector<8x8xf32>
    %18 = math.exp %17 : vector<8x8xf32>
    %cst_9 = arith.constant dense<0.000000e+00> : vector<8xf32>
    %19 = vector.multi_reduction <add>, %18, %cst_9 [1] : vector<8x8xf32> to vector<8xf32>
    %20 = vector.shape_cast %19 : vector<8xf32> to vector<8x1xf32>
    %21 = tpu.reciprocal %20 {approx = true} : vector<8x1xf32> -> vector<8x1xf32>
    %22 = vector.broadcast %21 : vector<8x1xf32> to vector<8x8xf32>
    %23 = arith.mulf %18, %22 : vector<8x8xf32>
    %cst_10 = arith.constant dense<0.000000e+00> : vector<8x8xf32>
    %24 = tpu.matmul %23, %12, %cst_10 {dimension_numbers = #tpu.dot_dimension_numbers<[1], [0], [0], [1], [0, 0, 1, 1], [], []>} : vector<8x8xf32>, vector<8x8xf32>, vector<8x8xf32> -> vector<8x8xf32>
    %c0_11 = arith.constant 0 : index
    %c0_12 = arith.constant 0 : index
    %25 = vector.load %arg10[%c0_11, %c0_12] : memref<8x32xf32, #tpu.memory_space<vmem>>, vector<8x8xf32>
    tpu.vector_store %arg10[%c0_11, %c0_12], %24 {strides = array<i32>} : memref<8x32xf32, #tpu.memory_space<vmem>>, vector<8x8xf32>,
    %26 = vector.extract_strided_slice %6 {offsets = [0, 8], sizes = [8, 8], strides = [1, 1]} : vector<8x32xf32> to vector<8x8xf32>
    %27 = vector.extract_strided_slice %8 {offsets = [0, 8], sizes = [8, 8], strides = [1, 1]} : vector<8x32xf32> to vector<8x8xf32>
    %28 = vector.extract_strided_slice %9 {offsets = [0, 8], sizes = [8, 8], strides = [1, 1]} : vector<8x32xf32> to vector<8x8xf32>
    %cst_13 = arith.constant dense<0.000000e+00> : vector<8x8xf32>
    %29 = tpu.matmul %26, %27, %cst_13 {dimension_numbers = #tpu.dot_dimension_numbers<[1], [1], [0], [0], [0, 0, 1, 0], [], []>} : vector<8x8xf32>, vector<8x8xf32>, vector<8x8xf32> -> vector<8x8xf32>
    %cst_14 = arith.constant dense<0xFF800000> : vector<8xf32>
    %30 = vector.multi_reduction <maximumf>, %29, %cst_14 [1] : vector<8x8xf32> to vector<8xf32>
    %31 = vector.shape_cast %30 : vector<8xf32> to vector<8x1xf32>
    %32 = vector.broadcast %31 : vector<8x1xf32> to vector<8x8xf32>
    %33 = arith.subf %29, %32 : vector<8x8xf32>
    %34 = math.exp %33 : vector<8x8xf32>
    %cst_15 = arith.constant dense<0.000000e+00> : vector<8xf32>
    %35 = vector.multi_reduction <add>, %34, %cst_15 [1] : vector<8x8xf32> to vector<8xf32>
    %36 = vector.shape_cast %35 : vector<8xf32> to vector<8x1xf32>
    %37 = tpu.reciprocal %36 {approx = true} : vector<8x1xf32> -> vector<8x1xf32>
    %38 = vector.broadcast %37 : vector<8x1xf32> to vector<8x8xf32>
    %39 = arith.mulf %34, %38 : vector<8x8xf32>
    %cst_16 = arith.constant dense<0.000000e+00> : vector<8x8xf32>
    %40 = tpu.matmul %39, %28, %cst_16 {dimension_numbers = #tpu.dot_dimension_numbers<[1], [0], [0], [1], [0, 0, 1, 1], [], []>} : vector<8x8xf32>, vector<8x8xf32>, vector<8x8xf32> -> vector<8x8xf32>
    %c0_17 = arith.constant 0 : index
    %c8 = arith.constant 8 : index
    %41 = vector.load %arg10[%c0_17, %c8] : memref<8x32xf32, #tpu.memory_space<vmem>>, vector<8x8xf32>
    tpu.vector_store %arg10[%c0_17, %c8], %40 {strides = array<i32>} : memref<8x32xf32, #tpu.memory_space<vmem>>, vector<8x8xf32>,
    %42 = vector.extract_strided_slice %6 {offsets = [0, 16], sizes = [8, 8], strides = [1, 1]} : vector<8x32xf32> to vector<8x8xf32>
    %43 = vector.extract_strided_slice %8 {offsets = [0, 16], sizes = [8, 8], strides = [1, 1]} : vector<8x32xf32> to vector<8x8xf32>
    %44 = vector.extract_strided_slice %9 {offsets = [0, 16], sizes = [8, 8], strides = [1, 1]} : vector<8x32xf32> to vector<8x8xf32>
    %cst_18 = arith.constant dense<0.000000e+00> : vector<8x8xf32>
    %45 = tpu.matmul %42, %43, %cst_18 {dimension_numbers = #tpu.dot_dimension_numbers<[1], [1], [0], [0], [0, 0, 1, 0], [], []>} : vector<8x8xf32>, vector<8x8xf32>, vector<8x8xf32> -> vector<8x8xf32>
    %cst_19 = arith.constant dense<0xFF800000> : vector<8xf32>
    %46 = vector.multi_reduction <maximumf>, %45, %cst_19 [1] : vector<8x8xf32> to vector<8xf32>
    %47 = vector.shape_cast %46 : vector<8xf32> to vector<8x1xf32>
    %48 = vector.broadcast %47 : vector<8x1xf32> to vector<8x8xf32>
    %49 = arith.subf %45, %48 : vector<8x8xf32>
    %50 = math.exp %49 : vector<8x8xf32>
    %cst_20 = arith.constant dense<0.000000e+00> : vector<8xf32>
    %51 = vector.multi_reduction <add>, %50, %cst_20 [1] : vector<8x8xf32> to vector<8xf32>
    %52 = vector.shape_cast %51 : vector<8xf32> to vector<8x1xf32>
    %53 = tpu.reciprocal %52 {approx = true} : vector<8x1xf32> -> vector<8x1xf32>
    %54 = vector.broadcast %53 : vector<8x1xf32> to vector<8x8xf32>
    %55 = arith.mulf %50, %54 : vector<8x8xf32>
    %cst_21 = arith.constant dense<0.000000e+00> : vector<8x8xf32>
    %56 = tpu.matmul %55, %44, %cst_21 {dimension_numbers = #tpu.dot_dimension_numbers<[1], [0], [0], [1], [0, 0, 1, 1], [], []>} : vector<8x8xf32>, vector<8x8xf32>, vector<8x8xf32> -> vector<8x8xf32>
    %c0_22 = arith.constant 0 : index
    %c16 = arith.constant 16 : index
    %57 = vector.load %arg10[%c0_22, %c16] : memref<8x32xf32, #tpu.memory_space<vmem>>, vector<8x8xf32>
    tpu.vector_store %arg10[%c0_22, %c16], %56 {strides = array<i32>} : memref<8x32xf32, #tpu.memory_space<vmem>>, vector<8x8xf32>,
    %58 = vector.extract_strided_slice %6 {offsets = [0, 24], sizes = [8, 8], strides = [1, 1]} : vector<8x32xf32> to vector<8x8xf32>
    %59 = vector.extract_strided_slice %8 {offsets = [0, 24], sizes = [8, 8], strides = [1, 1]} : vector<8x32xf32> to vector<8x8xf32>
    %60 = vector.extract_strided_slice %9 {offsets = [0, 24], sizes = [8, 8], strides = [1, 1]} : vector<8x32xf32> to vector<8x8xf32>
    %cst_23 = arith.constant dense<0.000000e+00> : vector<8x8xf32>
    %61 = tpu.matmul %58, %59, %cst_23 {dimension_numbers = #tpu.dot_dimension_numbers<[1], [1], [0], [0], [0, 0, 1, 0], [], []>} : vector<8x8xf32>, vector<8x8xf32>, vector<8x8xf32> -> vector<8x8xf32>
    %cst_24 = arith.constant dense<0xFF800000> : vector<8xf32>
    %62 = vector.multi_reduction <maximumf>, %61, %cst_24 [1] : vector<8x8xf32> to vector<8xf32>
    %63 = vector.shape_cast %62 : vector<8xf32> to vector<8x1xf32>
    %64 = vector.broadcast %63 : vector<8x1xf32> to vector<8x8xf32>
    %65 = arith.subf %61, %64 : vector<8x8xf32>
    %66 = math.exp %65 : vector<8x8xf32>
    %cst_25 = arith.constant dense<0.000000e+00> : vector<8xf32>
    %67 = vector.multi_reduction <add>, %66, %cst_25 [1] : vector<8x8xf32> to vector<8xf32>
    %68 = vector.shape_cast %67 : vector<8xf32> to vector<8x1xf32>
    %69 = tpu.reciprocal %68 {approx = true} : vector<8x1xf32> -> vector<8x1xf32>
    %70 = vector.broadcast %69 : vector<8x1xf32> to vector<8x8xf32>
    %71 = arith.mulf %66, %70 : vector<8x8xf32>
    %cst_26 = arith.constant dense<0.000000e+00> : vector<8x8xf32>
    %72 = tpu.matmul %71, %60, %cst_26 {dimension_numbers = #tpu.dot_dimension_numbers<[1], [0], [0], [1], [0, 0, 1, 1], [], []>} : vector<8x8xf32>, vector<8x8xf32>, vector<8x8xf32> -> vector<8x8xf32>
    %c0_27 = arith.constant 0 : index
    %c24 = arith.constant 24 : index
    %73 = vector.load %arg10[%c0_27, %c24] : memref<8x32xf32, #tpu.memory_space<vmem>>, vector<8x8xf32>
    tpu.vector_store %arg10[%c0_27, %c24], %72 {strides = array<i32>} : memref<8x32xf32, #tpu.memory_space<vmem>>, vector<8x8xf32>,
    %c0_28 = arith.constant 0 : index
    %c0_29 = arith.constant 0 : index
    %74 = vector.load %arg10[%c0_28, %c0_29] : memref<8x32xf32, #tpu.memory_space<vmem>>, vector<8x32xf32>
    %c0_30 = arith.constant 0 : index
    %c0_31 = arith.constant 0 : index
    %75 = vector.load %arg6[%c0_30, %c0_31] : memref<32x32xf32, #tpu.memory_space<vmem>>, vector<32x32xf32>
    %cst_32 = arith.constant dense<0.000000e+00> : vector<8x32xf32>
    %76 = tpu.matmul %74, %75, %cst_32 {dimension_numbers = #tpu.dot_dimension_numbers<[1], [0], [0], [1], [0, 0, 1, 1], [], []>} : vector<8x32xf32>, vector<32x32xf32>, vector<8x32xf32> -> vector<8x32xf32>
    %c0_33 = arith.constant 0 : index
    %c0_34 = arith.constant 0 : index
    %77 = vector.load %arg7[%c0_33, %c0_34] : memref<1x32xf32, #tpu.memory_space<vmem>>, vector<1x32xf32>
    %78 = vector.broadcast %77 : vector<1x32xf32> to vector<8x32xf32>
    %79 = arith.addf %76, %78 : vector<8x32xf32>
    %c0_35 = arith.constant 0 : index
    %c0_36 = arith.constant 0 : index
    %c0_37 = arith.constant 0 : index
    %80 = vector.load %arg8[%c0_35, %c0_36, %c0_37] : memref<1x8x32xf32, #tpu.memory_space<vmem>>, vector<1x8x32xf32>
    %81 = vector.shape_cast %80 : vector<1x8x32xf32> to vector<8x32xf32>
    %82 = vector.shape_cast %79 : vector<8x32xf32> to vector<1x8x32xf32>
    tpu.vector_store %arg8[%c0_35, %c0_36, %c0_37], %82 {strides = array<i32>} : memref<1x8x32xf32, #tpu.memory_space<vmem>>, vector<1x8x32xf32>,
    return
  }
  func.func @transform_0(%arg0: i32, %arg1: i32) -> (i32, i32, i32) {
    %c0_i32 = arith.constant 0 : i32
    %c0_i32_0 = arith.constant 0 : i32
    return %arg0, %arg1, %c0_i32 : i32, i32, i32
  }
  func.func @transform_1(%arg0: i32, %arg1: i32) -> (i32, i32, i32) {
    %c0_i32 = arith.constant 0 : i32
    %c0_i32_0 = arith.constant 0 : i32
    %c0_i32_1 = arith.constant 0 : i32
    return %arg0, %c0_i32, %c0_i32_0 : i32, i32, i32
  }
  func.func @transform_2(%arg0: i32, %arg1: i32) -> (i32, i32) {
    %c0_i32 = arith.constant 0 : i32
    %c0_i32_0 = arith.constant 0 : i32
    %c0_i32_1 = arith.constant 0 : i32
    return %c0_i32, %c0_i32_0 : i32, i32
  }
  func.func @transform_3(%arg0: i32, %arg1: i32) -> (i32, i32) {
    %c0_i32 = arith.constant 0 : i32
    %c0_i32_0 = arith.constant 0 : i32
    %c0_i32_1 = arith.constant 0 : i32
    return %c0_i32, %c0_i32_0 : i32, i32
  }
  func.func @transform_4(%arg0: i32, %arg1: i32) -> (i32, i32) {
    %c0_i32 = arith.constant 0 : i32
    %c0_i32_0 = arith.constant 0 : i32
    %c0_i32_1 = arith.constant 0 : i32
    return %c0_i32, %c0_i32_0 : i32, i32
  }
  func.func @transform_5(%arg0: i32, %arg1: i32) -> (i32, i32) {
    %c0_i32 = arith.constant 0 : i32
    %c0_i32_0 = arith.constant 0 : i32
    %c0_i32_1 = arith.constant 0 : i32
    return %c0_i32, %c0_i32_0 : i32, i32
  }
  func.func @transform_6(%arg0: i32, %arg1: i32) -> (i32, i32, i32) {
    %c0_i32 = arith.constant 0 : i32
    %c0_i32_0 = arith.constant 0 : i32
    return %arg0, %arg1, %c0_i32 : i32, i32, i32
  }
}

</mosaic_0001>

<bundles_post_ra>
// kernel: tpu_custom_call.1
= control target key start
LH: loop header
LB: loop body
LE: loop exit
PB: predicated region body
PF: predicated region fallthrough
CT: control target
= control target key end

     0   :  { %s2423_s0 = inlined_call_operand.hbm [shape: f32[2,8,32], index: 0, kind: input, shape index: {}]   ;;  %s2424_s1 = inlined_call_operand.hbm [shape: f32[2,8,32], index: 1, kind: input, shape index: {}]   ;;  %s2425_s2 = inlined_call_operand.hbm [shape: f32[32,32], index: 2, kind: input, shape index: {}]   ;;  %s2426_s3 = inlined_call_operand.hbm [shape: f32[32,64], index: 3, kind: input, shape index: {}]   ;;  %s2427_s4 = inlined_call_operand.hbm [shape: f32[32,32], index: 4, kind: input, shape index: {}]   ;;  %s2428_s5 = inlined_call_operand.vmem [shape: f32[1,32], index: 5, kind: input, shape index: {}]   ;;  %s2429_s6 = inlined_call_operand.hbm [shape: f32[2,8,32], index: 6, kind: output, shape index: {}]  }
   0x1   :  { %2436 = sst [smem:[#allocation21_spill]] %s2425_s2 }
   0x2   :  { %2437 = sst [smem:[#allocation22_spill]] %s2426_s3 }
   0x3   :  { %2438 = sst [smem:[#allocation23_spill]] %s2427_s4 }
   0x4   :  { %11 = vsyncpa [#allocation5], 0 }
   0x5   :  { %13 = vsyncpa [#allocation5 + $0x1], 0 }
   0x6   :  { %14 = vsyncpa [#allocation8], 0 }
   0x7   :  { %16 = vsyncpa [#allocation8 + $0x1], 0 }
   0x8   :  { %17 = vsyncpa [#allocation11], 0 }
   0x9   :  { %18 = vsyncpa [#allocation6], 0 }
   0xa   :  { %20 = vsyncpa [#allocation6 + $0x1], 0  ;;  %s2024_s21 = smov 0   ;;  %s2026_s22 = smov 0  }
   0xb   :  { %s2028_s23 = smov 0   ;;  %s2030_s24 = smov 0  }
   0xc   :  { %s2032_s25 = smov 0   ;;  %s2034_s26 = smov 0  }
   0xd LB: > { %2439 = sst [smem:[#allocation19_spill]] %s1946_s21  ;;  %s2055_s27 = sadd.s32 4294967295, %s1966_s26   ;;  %s1966_s26 = sphi %s2034_s26, %s26_s26   ;;  %s1962_s25 = sphi %s2032_s25, %s2467_s25   ;;  %s1958_s24 = sphi %s2030_s24, %s2466_s24   ;;  %s1954_s23 = sphi %s2028_s23, %s2465_s23   ;;  %s1950_s22 = sphi %s2026_s22, %s2464_s22   ;;  %s1946_s21 = sphi %s2024_s21, %s2463_s21  }
   0xe   : > { %s1440_s28 = sadd.s32 4294967294, %s1966_s26   ;;  %p60_p0 = scmp.ne.s32.totalorder %s1950_s22, %s1946_s21 }
   0xf   : > { %p2430_p1 = scmp.eq.s32.totalorder %s2055_s27, 0  ;;  %p202_p3 = scmp.eq.s32.totalorder %s1440_s28, 1 }
  0x10   : > { %p1441_p5 = scmp.ge.s32.totalorder %s1966_s26, 1  ;;  %p209_p7 = scmp.lt.s32.totalorder %s1966_s26, 3 }
  0x11   : > { %p2064_p4 = por %p2430_p1, %p60_p0  ;;  %p2069_p6 = por %p202_p3, %p60_p0 }
  0x12   : > { %p2074_p8 = pnand %p1441_p5, %p209_p7  ;;  %s1968_s8 = smov [#allocation9]  }
  0x13   : > { %s2440_s29 = scalar_select %p2064_p4, 1, 0 }
  0x14   : > { %s2441_s30 = scalar_select %p2069_p6, 1, 0 }
  0x15   : > { %s2443_s7 = scalar_select %p2074_p8, 1, 0 }
  0x16   : > { %2442 = sst [smem:[#allocation20_spill]] %s2441_s30  ;;  %s221_s9 = sshll.u32 %s1968_s8, 4  ;;  %s2078_s9 = int_to_ptr.vmem [resolvable:$true] %s221_s9 }
  0x17   : > { %p1617_p9 = pneg %p2074_p8  ;;  %s1969_s11 = smov [#allocation10]  }
  0x18   : > { %s234_s12 = sshll.u32 %s1969_s11, 4  ;;  %s1970_s13 = smov [#allocation12]   ;;  %s2089_s12 = int_to_ptr.vmem [resolvable:$true] %s234_s12 }
  0x19   : > { %p2085_p11 = pnand %p1617_p9, %p2430_p1  ;;  %s2091_s14 = sshll.u32 %s1970_s13, 4  ;;  %s248_s14 = int_to_ptr.vmem [resolvable:$true] %s2091_s14 }
  0x1a   : > { %s2445_s2 = sld [smem:[#allocation21_spill]] }
  0x1b   : > { %p2101_p13 = pneg %p2085_p11 }
  0x20   : > { %s1728_s17 = scalar_lea.hbm %s2445_s2, 512 }
  0x21   : > { %p1729_p12 = scmp.ne.s32.totalorder %s2445_s2, %s1728_s17  ;;  %p1735_p5 = scmp.lt.u32.totalorder %s1728_s17, %s2445_s2 }
  0x23   : > { %p1731_p0 = pnand %p2101_p13, %p1729_p12 }
  0x25   : > { %p1732_p3 = pneg %p1731_p0 }
  0x27   : > { %p1737_p7 = pnand %p1735_p5, %p1732_p3 }
  0x29   : > { %1740 = shalt.err (!%p1737_p7)
}
  0x2a   : > { %s1741_s11 = scalar_lea.vmem %s2078_s9, 512  ;;  %p1749_p2 = scmp.lt.s32.totalorder %s2078_s9, %s2078_s9 }
  0x2b   : > { %p1742_p9 = scmp.ne.s32.totalorder %s2078_s9, %s1741_s11  ;;  %p1750_p6 = scmp.lt.s32.totalorder %s1741_s11, %s1741_s11 }
  0x2d   : > { %p1744_p10 = pnand %p1742_p9, %p2101_p13  ;;  %p1751_p12 = por %p1750_p6, %p1749_p2 }
  0x2f   : > { %p1745_p1 = pneg %p1744_p10 }
  0x31   : > { %p1752_p0 = pnand %p1751_p12, %p1745_p1 }
  0x33   : > { %1755 = shalt.err (!%p1752_p0)
}
  0x34   : > { %s1971_s13 = smov 128   ;;  %s1972_s15 = smov 8  }
  0x35   : > { %1620 = dma.hbm_to_vmem [thread:$0]  (!%p2085_p11), %s2445_s2, 512, %s2078_s9, [#allocation8], %s1971_s13, %s1971_s13, %s1972_s15  }
  0x36   : > { %s2447_s3 = sld [smem:[#allocation22_spill]] }
  0x3c   : > { %s1756_s28 = scalar_lea.hbm %s2447_s3, 512 }
  0x3d   : > { %p1757_p1 = scmp.ne.s32.totalorder %s2447_s3, %s1756_s28  ;;  %p1763_p10 = scmp.lt.u32.totalorder %s1756_s28, %s2447_s3 }
  0x3f   : > { %p1759_p2 = pnand %p1757_p1, %p2101_p13 }
  0x41   : > { %p1760_p6 = pneg %p1759_p2 }
  0x43   : > { %p1765_p3 = pnand %p1763_p10, %p1760_p6 }
  0x45   : > { %1768 = shalt.err (!%p1765_p3)
}
  0x46   : > { %s1769_s9 = scalar_lea.vmem %s2089_s12, 512  ;;  %p1777_p12 = scmp.lt.s32.totalorder %s2089_s12, %s2089_s12 }
  0x47   : > { %p1770_p5 = scmp.ne.s32.totalorder %s2089_s12, %s1769_s9  ;;  %p1778_p0 = scmp.lt.s32.totalorder %s1769_s9, %s1769_s9 }
  0x49   : > { %p1772_p7 = pnand %p1770_p5, %p2101_p13  ;;  %p1779_p1 = por %p1778_p0, %p1777_p12 }
  0x4b   : > { %p1773_p9 = pneg %p1772_p7 }
  0x4d   : > { %p1780_p2 = pnand %p1779_p1, %p1773_p9 }
  0x4f   : > { %1783 = shalt.err (!%p1780_p2)
}
  0x50   : > { %1623 = dma.hbm_to_vmem [thread:$0]  (!%p2085_p11), %s2447_s3, 512, %s2089_s12, [#allocation11], %s1971_s13, %s1971_s13, %s1972_s15  }
  0x51   : > { %s2448_s4 = sld [smem:[#allocation23_spill]] }
  0x57   : > { %s1784_s18 = scalar_lea.hbm %s2448_s4, 512 }
  0x58   : > { %p1785_p6 = scmp.ne.s32.totalorder %s2448_s4, %s1784_s18  ;;  %p1791_p5 = scmp.lt.u32.totalorder %s1784_s18, %s2448_s4 }
  0x5a   : > { %p1787_p10 = pnand %p1785_p6, %p2101_p13 }
  0x5c   : > { %p1788_p3 = pneg %p1787_p10 }
  0x5e   : > { %p1793_p7 = pnand %p1791_p5, %p1788_p3 }
  0x60   : > { %1796 = shalt.err (!%p1793_p7)
}
  0x61   : > { %s1797_s9 = scalar_lea.vmem %s248_s14, 512  ;;  %p1805_p1 = scmp.lt.s32.totalorder %s248_s14, %s248_s14 }
  0x62   : > { %p1798_p9 = scmp.ne.s32.totalorder %s248_s14, %s1797_s9  ;;  %p1806_p2 = scmp.lt.s32.totalorder %s1797_s9, %s1797_s9 }
  0x64   : > { %p1800_p12 = pnand %p1798_p9, %p2101_p13  ;;  %p1807_p4 = por %p1806_p2, %p1805_p1 }
  0x66   : > { %p1801_p0 = pneg %p1800_p12 }
  0x68   : > { %p1808_p8 = pnand %p1807_p4, %p1801_p0 }
  0x6a   : > { %1811 = shalt.err (!%p1808_p8)
}
  0x6b   : > { %1626 = dma.hbm_to_vmem [thread:$0]  (!%p2085_p11), %s2448_s4, 512, %s248_s14, [#allocation11], %s1971_s13, %s1971_s13, %s1972_s15  }
  0x6c   : > { %s47_s20 = sadd.s32 1, %s1954_s23  ;;  %s38_s10 = sadd.s32 1, %s1962_s25 }
  0x6d   : > { %p54_p4 = scmp.ne.s32.totalorder %s1954_s23, %s1950_s22  ;;  %p40_p8 = scmp.ge.s32.totalorder %s38_s10, 2 }
  0x6e   : > { %p55_p13 = scmp.eq.s32.totalorder %s1966_s26, 0  ;;  %p2449_p6 = scmp.eq.s32.totalorder %s2055_s27, 1 }
  0x6f   : > { %p1641_p3 = scmp.lt.s32.totalorder %s1966_s26, 2  ;;  %s2469_s10 = smov (%p40_p8, %s38_s10), 0 }
  0x70   : > { %p2180_p10 = por %p2449_p6, %p54_p4  ;;  %p56_p5 = por %p55_p13, %p54_p4 }
  0x71   : > { %s264_s16 = sand.u32 1, %s1954_s23   ;;  %s42_s17 = ssub.s32 %s1962_s25, %s2469_s10 }
  0x72   : > { %s2450_s30 = scalar_select %p2180_p10, 1, 0 }
  0x73   : > { %p45_p11 = scmp.eq.s32.totalorder %s42_s17, 0  ;;  %s2190_s14 = sshll.u32 %s264_s16, 3 }
  0x74   : > { %s1447_s13 = sshll.u32 %s1962_s25, 7  ;;  %s268_s8 = scalar_lea.vmem [#allocation4], %s2190_s14 }
  0x75   : > { %s2194_s15 = scalar_select %p45_p11, %s1954_s23, %s47_s20  }
  0x76   : > { %s2199_s28 = scalar_lea.hbm %s2423_s0, %s1447_s13  ;;  %s276_s11 = sshll.u32 %s268_s8, 4  ;;  %s2202_s11 = int_to_ptr.vmem [resolvable:$true] %s276_s11 }
  0x77   : > { %p2206_p7 = pnand %p1641_p3, %p56_p5  ;;  %s2213_s20 = scalar_lea.hbm %s2424_s1, %s1447_s13 }
  0x78   : > { %s283_s17 = sand.u32 1, %s1966_s26   ;;  %s265_s18 = scalar_lea.sflag [#allocation5], %s264_s16 }
  0x79   : > { %s1812_s19 = scalar_lea.hbm %s2199_s28, 128  ;;  %p1814_p12 = pneg %p2206_p7 }
  0x7a   : > { %p1813_p9 = scmp.ne.s32.totalorder %s2199_s28, %s1812_s19  ;;  %s1817_s3 = scalar_lea.hbm %s2423_s0, 256 }
  0x7b   : > { %p1818_p2 = scmp.lt.u32.totalorder %s2199_s28, %s2423_s0  ;;  %p1819_p4 = scmp.lt.u32.totalorder %s1817_s3, %s1812_s19 }
  0x7c   : > { %p1815_p0 = pnand %p1814_p12, %p1813_p9  ;;  %p1821_p13 = scmp.lt.u32.totalorder %s1812_s19, %s2199_s28 }
  0x7d   : > { %p1820_p8 = por %p1819_p4, %p1818_p2 }
  0x7e   : > { %p1816_p1 = pneg %p1815_p0 }
  0x7f   : > { %p1822_p6 = por %p1821_p13, %p1820_p8 }
  0x81   : > { %p1823_p3 = pnand %p1822_p6, %p1816_p1 }
  0x83   : > { %1826 = shalt.err (!%p1823_p3)
}
  0x84   : > { %s1827_s16 = scalar_lea.vmem %s2202_s11, 128  ;;  %s1973_s2 = smov [#allocation4]  }
  0x85   : > { %p1828_p5 = scmp.ne.s32.totalorder %s2202_s11, %s1827_s16  ;;  %s1832_s13 = sshll.u32 %s1973_s2, 4  ;;  %s1833_s13 = int_to_ptr.vmem [resolvable:$false] %s1832_s13 }
  0x86   : > { %s1834_s4 = scalar_lea.vmem %s1833_s13, 256  ;;  %p1835_p0 = scmp.lt.s32.totalorder %s2202_s11, %s1833_s13 }
  0x87   : > { %p1830_p11 = pnand %p1828_p5, %p1814_p12  ;;  %p1836_p2 = scmp.lt.s32.totalorder %s1834_s4, %s1827_s16 }
  0x89   : > { %p1831_p9 = pneg %p1830_p11  ;;  %p1837_p4 = por %p1836_p2, %p1835_p0 }
  0x8b   : > { %p1838_p8 = pnand %p1837_p4, %p1831_p9 }
  0x8d   : > { %1841 = shalt.err (!%p1838_p8)
}
  0x8e   : > { %1630 = dma.hbm_to_vmem [thread:$0]  (!%p2206_p7), %s2199_s28, 128, %s2202_s11, %s265_s18  }
  0x8f   : > { %s287_s3 = scalar_lea.vmem [#allocation7], %s2190_s14  ;;  %s284_s19 = scalar_lea.sflag [#allocation8], %s283_s17 }
  0x90   : > { %s294_s21 = sshll.u32 %s287_s3, 4  ;;  %s1842_s8 = scalar_lea.hbm %s2213_s20, 128  ;;  %s295_s21 = int_to_ptr.vmem [resolvable:$true] %s294_s21 }
  0x91   : > { %p1843_p1 = scmp.ne.s32.totalorder %s2213_s20, %s1842_s8  ;;  %s1847_s2 = scalar_lea.hbm %s2424_s1, 256 }
  0x92   : > { %p1848_p3 = scmp.lt.u32.totalorder %s2213_s20, %s2424_s1  ;;  %p1849_p5 = scmp.lt.u32.totalorder %s1847_s2, %s1842_s8 }
  0x93   : > { %p1845_p13 = pnand %p1843_p1, %p1814_p12  ;;  %p1851_p9 = scmp.lt.u32.totalorder %s1842_s8, %s2213_s20 }
  0x94   : > { %p1850_p11 = por %p1849_p5, %p1848_p3 }
  0x95   : > { %p1846_p6 = pneg %p1845_p13 }
  0x96   : > { %p1852_p0 = por %p1851_p9, %p1850_p11 }
  0x98   : > { %p1853_p2 = pnand %p1852_p0, %p1846_p6 }
  0x9a   : > { %1856 = shalt.err (!%p1853_p2)
}
  0x9b   : > { %s1857_s14 = scalar_lea.vmem %s295_s21, 128  ;;  %s1974_s28 = smov [#allocation7]  }
  0x9c   : > { %p1858_p4 = scmp.ne.s32.totalorder %s295_s21, %s1857_s14  ;;  %s1862_s11 = sshll.u32 %s1974_s28, 4  ;;  %s1863_s11 = int_to_ptr.vmem [resolvable:$false] %s1862_s11 }
  0x9d   : > { %s1864_s17 = scalar_lea.vmem %s1863_s11, 256  ;;  %p1865_p13 = scmp.lt.s32.totalorder %s295_s21, %s1863_s11 }
  0x9e   : > { %p1860_p8 = pnand %p1858_p4, %p1814_p12  ;;  %p1866_p10 = scmp.lt.s32.totalorder %s1864_s17, %s1857_s14 }
  0xa0   : > { %p1861_p1 = pneg %p1860_p8  ;;  %p1867_p3 = por %p1866_p10, %p1865_p13 }
  0xa2   : > { %p1868_p5 = pnand %p1867_p3, %p1861_p1 }
  0xa4   : > { %1871 = shalt.err (!%p1868_p5)
}
  0xa5   : > { %1633 = dma.hbm_to_vmem [thread:$0]  (!%p2206_p7), %s2213_s20, 128, %s295_s21, %s284_s19  }
  0xa6   : > { %p2452_p6 = scmp.ne.s32.totalorder %s2443_s7, 0 }
  0xa7   : > { %s2266_s18 = sand.u32 (!%p2452_p6), 1, %s1950_s22   ;;  %p2453_p10 = scmp.ne.s32.totalorder (!%p2452_p6), %s2440_s29, 0 }
  0xa8   : > { %303 = sbr.rel (%p2452_p6) target bundleno = 1632 (0x660), region = 44  ;;  %s2269_s3 = sshll.u32 (!%p2452_p6), %s2266_s18, 3 }
  0xa9   : > { %s306_s8 = scalar_lea.sflag (!%p2452_p6), [#allocation5], %s2266_s18  ;;  %s309_s12 = scalar_lea.vmem (!%p2452_p6), [#allocation4], %s2269_s3 }
  0xaf   : > { %1925 = dma.done.wait (%p2453_p10), %s306_s8, 128  }
  0xb0   : > { %1927 = vsyncadd (%p2453_p10), %s306_s8, 4294967168  ;;  %s314_s7 = sand.u32 1, %s2055_s27   ;;  %s318_s20 = scalar_lea.vmem [#allocation7], %s2269_s3 }
  0xb1   : > { %s315_s9 = scalar_lea.sflag [#allocation8], %s314_s7 }
  0xb2   : > { %1929 = dma.done.wait (%p2453_p10), %s315_s9, 128  }
  0xb3   : > { %1931 = vsyncadd (%p2453_p10), %s315_s9, 4294967168  ;;  %p2454_p7 = scmp.eq.s32.totalorder %s2055_s27, 0 }
  0xb5   : > { %1933 = dma.done.wait (%p2454_p7), [#allocation8], 512   ;;  %p2455_p12 = pmov %p2454_p7 }
  0xb6   : > { %p2456_p11 = pmov %p2454_p7 }
  0xb7   : > { %1935 = vsyncadd (%p2455_p12), [#allocation8], 4294966784 }
  0xb8   : > { %1937 = dma.done.wait (%p2456_p11), [#allocation11], 1024   ;;  %p2457_p9 = pmov %p2454_p7 }
  0xb9   : > { %v1975_v0 = vmov 0.0|0.0   ;;  %vm1976_vm0 = vmmov 0   ;;  %v1977_v1 = vmov 0.0   ;;  %v370_v2 = vld [vmem:[#allocation10] sm:$0xff]  ;;  %v371_v3 = vld [vmem:[#allocation10 + $0x8] sm:$0xff]  ;;  %v372_v4 = vld [vmem:[#allocation10 + $0x10] sm:$0xff] }
  0xba   : > { %1939 = vsyncadd (%p2457_p9), [#allocation11], 4294966272  ;;  %1581 = vmatprep.subr.bf16.mxu0 %v1975_v0  ;;  %1516 = vmatprep.mubr.msk.f32.mxu0 %vm1976_vm0, %v1977_v1  ;;  %v1582_v5 = vpack.c.bf16 %v371_v3, %v370_v2  ;;  %v373_v6 = vld [vmem:[#allocation10 + $0x18] sm:$0xff]  ;;  %v450_v7 = vld [vmem:[#allocation9] sm:$0xff]  ;;  %vm374_vm1 = vcmask 261120   ;;  %vm448_vm2 = vcmask 523264  }
  0xbb   : > { %1587 = vmatprep.subr.bf16.mxu1 %v1975_v0  ;;  %1527 = vmatprep.mubr.msk.f32.mxu1 %vm1976_vm0, %v1977_v1  ;;  %v451_v8 = vld [vmem:[#allocation9 + $0x8] sm:$0xff]  ;;  %v452_v9 = vld [vmem:[#allocation9 + $0x10] sm:$0xff]  ;;  %v453_v10 = vld [vmem:[#allocation9 + $0x18] sm:$0xff]  ;;  %v1585_v11 = vpack.c.bf16 %v373_v6, %v372_v4  ;;  %vm529_vm3 = vcmask 64512   ;;  %s1978_s27 = smov 112   ;;  %s1979_s29 = smov 120  }
  0xbc   : > { %1583 = vmatpush3.bf16.msra.mxu0 %v1582_v5  ;;  %v1588_v12 = vpack.c.bf16 %v451_v8, %v450_v7  ;;  %v1591_v13 = vpack.c.bf16 %v453_v10, %v452_v9  ;;  %v369_v14 = vld [vmem:[%s318_s20] sm:$0xff]  ;;  %v364_v15 = vld [vmem:[%s309_s12] sm:$0xff]  ;;  %s1980_s21 = smov 104   ;;  %s1981_s19 = smov 96   ;;  %vm863_vm4 = vcmask 130112   ;;  %vm1034_vm5 = vcmask 195712  }
  0xbd   : > { %1584 = vmatprep.subr.bf16.mxu0 %v1975_v0  ;;  %s1982_s16 = smov 80   ;;  %s1983_s2 = smov 72   ;;  %vm1205_vm6 = vcmask 261312  }
  0xbe   : > { %1589 = vmatpush3.bf16.msra.mxu1 %v1588_v12  ;;  %s1984_s13 = smov 88   ;;  %s1985_s4 = smov 8  }
  0xbf   : > { %1590 = vmatprep.subr.bf16.mxu1 %v1975_v0  ;;  %s1986_s14 = smov 16   ;;  %s1987_s28 = smov 24  }
  0xc0   : > { %1586 = vmatpush3.bf16.msra.mxu0 %v1585_v11  ;;  %s1474_s8 = sshll.u32 %s1958_s24, 7  ;;  %s363_s12 = scalar_lea.vmem [#allocation13], %s2269_s3 }
  0xc1   : > { %1540 = vmatprep.subr.mxu0 %v1977_v1  ;;  %s1308_s7 = sshll.u32 %s363_s12, 4  ;;  %p2458_p2 = scmp.ne.s32.totalorder %s2450_s30, 0  ;;  %s2375_s7 = int_to_ptr.vmem [resolvable:$true] %s1308_s7 }
  0xc2   : > { %1592 = vmatpush3.bf16.msra.mxu1 %v1591_v13  ;;  %s1988_s24 = smov [#allocation13]  }
  0xc3   : > { %1517 = vmatmul.mubr.msk.f32.vlgmr.msra.gmra.mrb[0].mxu0 %vm374_vm1, %v369_v14  ;;  %1530 = vmatprep.subr.mxu1 %v1977_v1  ;;  %s1876_s3 = sshll.u32 %s1988_s24, 4  ;;  %s1877_s3 = int_to_ptr.vmem [resolvable:$false] %s1876_s3 }
  0xc4   : > { %1542 = vmatprep.mubr.msk.f32.mxu0 %vm1976_vm0, %v1977_v1  ;;  %p1879_p1 = scmp.lt.s32.totalorder %s2375_s7, %s1877_s3 }
  0xc5   : > { %1528 = vmatmul.mubr.msk.f32.vlgmr.msra.gmra.mrb[0].mxu1 %vm374_vm1, %v364_v15  ;;  %v1208_v15 = vld [vmem:[#allocation12] sm:$0xff] }
  0xc6   : > { %1532 = vmatprep.mubr.msk.f32.mxu1 %vm1976_vm0, %v1977_v1 }
 0x196   : > { %v444_v16 = vpop.f32.mrb[0].mxu0 }
 0x197   : > { %449 = vst.msk [vmem:[#allocation2] sm:$0xff] %vm448_vm2, %v444_v16  ;;  %v1518_v17 = vpop.f32.mrb[1].mxu0  ;;  %v1209_v16 = vld [vmem:[#allocation12 + $0x8] sm:$0xff] }
 0x198   : > { %v524_v18 = vpop.f32.mrb[0].mxu1  ;;  %v1594_v17 = vpack.c.bf16 %v1209_v16, %v1208_v15 }
 0x199   : > { %v1529_v19 = vpop.f32.mrb[1].mxu1 }
 0x19a   : > { %v1211_v19 = vld [vmem:[#allocation12 + $0x18] sm:$0xff] }
 0x19e   : > { %v2311_v20 = vld [vmem:[#allocation2] sm:$0xff] }
 0x19f   : > { %867 = vrot.lane.b32.xlu1 %v2311_v20, %s1978_s27  ;;  %696 = vrot.lane.b32.xlu0 %v2311_v20, %s1979_s29 }
 0x1a0   : > { %1531 = vmatpush3.xpose.msk.msra.mxu1 %vm529_vm3, %v2311_v20 }
 0x1a1   : > { %1535 = vmatprep.subr.mxu1 %v1977_v1 }
 0x1a3   : > { %1533 = vmatmul.mubr.msk.f32.vlgmr.msra.gmra.mrb[2].mxu1 %vm529_vm3, %v524_v18  ;;  %865 = vrot.lane.b32.xlu1 %v524_v18, %s1978_s27  ;;  %s2373_s27 = scalar_lea.hbm %s2429_s6, %s1474_s8 }
 0x1a4   : > { %694 = vrot.lane.b32.xlu0 %v524_v18, %s1979_s29  ;;  %1537 = vmatprep.mubr.msk.f32.mxu1 %vm1976_vm0, %v1977_v1  ;;  %s1294_s29 = scalar_lea.sflag [#allocation6], %s2266_s18 }
 0x1a7   : > { %1036 = vrot.lane.b32.xlu1 %v524_v18, %s1980_s21  ;;  %v1210_v18 = vld [vmem:[#allocation12 + $0x10] sm:$0xff] }
 0x1a8   : > { %1038 = vrot.lane.b32.xlu0 %v2311_v20, %s1980_s21  ;;  %s1872_s21 = scalar_lea.vmem %s2375_s7, 128 }
 0x1a9   : > { %p1873_p0 = scmp.ne.s32.totalorder %s2375_s7, %s1872_s21 }
 0x1ab   : > { %p1874_p4 = pnand %p1873_p0, %p2458_p2 }
 0x1ad   : > { %p1875_p8 = pneg %p1874_p4 }
 0x211   : > { %v697_v21 = vpop.permute.xlu0 %696  ;;  %v868_v22 = vpop.permute.xlu1 %867 }
 0x212   : > { %1541 = vmatpush3.xpose.msk.msra.mxu0 %vm529_vm3, %v697_v21 }
 0x213   : > { %1550 = vmatprep.subr.mxu0 %v1977_v1 }
 0x215   : > { %v866_v24 = vpop.permute.xlu1 %865 }
 0x216   : > { %v695_v23 = vpop.permute.xlu0 %694 }
 0x217   : > { %1543 = vmatmul.mubr.msk.f32.vlgmr.msra.gmra.mrb[2].mxu0 %vm529_vm3, %v695_v23 }
 0x218   : > { %1551 = vmatpush3.xpose.msk.msra.mxu0 %vm529_vm3, %v868_v22  ;;  %1552 = vmatprep.mubr.msk.f32.mxu0 %vm1976_vm0, %v1977_v1 }
 0x219   : > { %1560 = vmatprep.subr.mxu0 %v1977_v1  ;;  %v1037_v26 = vpop.permute.xlu1 %1036 }
 0x21a   : > { %v1039_v25 = vpop.permute.xlu0 %1038 }
 0x21b   : > { %1553 = vmatmul.mubr.msk.f32.vlgmr.msra.gmra.mrb[4].mxu0 %vm529_vm3, %v866_v24 }
 0x21c   : > { %1561 = vmatpush3.xpose.msk.msra.mxu0 %vm529_vm3, %v1039_v25  ;;  %1562 = vmatprep.mubr.msk.f32.mxu0 %vm1976_vm0, %v1977_v1 }
 0x21d   : > { %1593 = vmatprep.subr.bf16.mxu0 %v1975_v0 }
 0x21f   : > { %1563 = vmatmul.mubr.msk.f32.vlgmr.msra.gmra.mrb[6].mxu0 %vm529_vm3, %v1037_v26 }
 0x220   : > { %1578 = vmatprep.mubr.msk.f32.mxu0 %vm1976_vm0, %v1977_v1  ;;  %1595 = vmatpush3.bf16.msra.mxu0 %v1594_v17 }
 0x221   : > { %1596 = vmatprep.subr.bf16.mxu0 %v1975_v0 }
 0x276   : > { %v602_v27 = vpop.f32.mrb[2].mxu1 }
 0x277   : > { %v1534_v28 = vpop.f32.mrb[3].mxu1  ;;  %v606_v29 = vsel %vm529_vm3, %v602_v27, -inf }
 0x278   : > { %607 = vmax.xlane.f32.xlu0 %v606_v29  ;;  %v1471_v29 = vld [vmem:[%s2428_s5] ss:$0 sm:$0xff] }
 0x2ea   : > { %v768_v30 = vpop.f32.mrb[2].mxu0 }
 0x2eb   : > { %v1544_v31 = vpop.f32.mrb[3].mxu0  ;;  %v772_v32 = vsel %vm529_vm3, %v768_v30, -inf }
 0x2ec   : > { %773 = vmax.xlane.f32.xlu1 %v772_v32 }
 0x2ee   : > { %v939_v33 = vpop.f32.mrb[4].mxu0 }
 0x2ef   : > { %v1554_v34 = vpop.f32.mrb[5].mxu0  ;;  %v943_v35 = vsel %vm529_vm3, %v939_v33, -inf }
 0x2f0   : > { %944 = vmax.xlane.f32.xlu0 %v943_v35 }
 0x2f2   : > { %v1110_v36 = vpop.f32.mrb[6].mxu0 }
 0x2f3   : > { %v1564_v37 = vpop.f32.mrb[7].mxu0  ;;  %v1114_v38 = vsel %vm529_vm3, %v1110_v36, -inf }
 0x2f4   : > { %1115 = vmax.xlane.f32.xlu0 %v1114_v38 }
 0x2fd   : > { %617 = vrot.lane.b32.xlu1 %v2311_v20, %s1981_s19  ;;  %s1878_s19 = scalar_lea.vmem %s1877_s3, 256 }
 0x2fe   : > { %p1880_p13 = scmp.lt.s32.totalorder %s1878_s19, %s1872_s21 }
 0x300   : > { %p1881_p3 = por %p1880_p13, %p1879_p1 }
 0x302   : > { %p1882_p5 = pnand %p1881_p3, %p1875_p8 }
 0x305   : > { %v608_v39 = vpop.xlane.xlu0 %607 }
 0x306   : > { %v609_v40 = vsub.f32 %v602_v27, %v608_v39 }
 0x308   : > { %v610_v41 = vmul.f32 1.442695, %v609_v40 }
 0x30a   : > { %1712 = vpow2.f32 %v610_v41 }
 0x314   : > { %v1713_v42 = vpop.eup %1712 }
 0x315   : > { %v612_v43 = vsel %vm529_vm3, %v1713_v42, 0.0 }
 0x321   : > { %613 = vadd.xlane.f32.xlu1 %v612_v43 }
 0x379   : > { %v774_v44 = vpop.xlane.xlu1 %773 }
 0x37a   : > { %v775_v45 = vsub.f32 %v768_v30, %v774_v44 }
 0x37c   : > { %v776_v46 = vmul.f32 1.442695, %v775_v45 }
 0x37d   : > { %v618_v47 = vpop.permute.xlu1 %617  ;;  %v945_v48 = vpop.xlane.xlu0 %944 }
 0x37e   : > { %1714 = vpow2.f32 %v776_v46  ;;  %v946_v49 = vsub.f32 %v939_v33, %v945_v48  ;;  %1536 = vmatpush3.msra.mxu1 %v618_v47 }
 0x37f   : > { %1545 = vmatprep.subr.mxu1 %v1977_v1 }
 0x380   : > { %v947_v50 = vmul.f32 1.442695, %v946_v49 }
 0x381   : > { %v1116_v51 = vpop.xlane.xlu0 %1115 }
 0x382   : > { %1716 = vpow2.f32 %v947_v50  ;;  %v1117_v52 = vsub.f32 %v1110_v36, %v1116_v51 }
 0x384   : > { %v1118_v53 = vmul.f32 1.442695, %v1117_v52 }
 0x386   : > { %1718 = vpow2.f32 %v1118_v53 }
 0x388   : > { %v1715_v54 = vpop.eup %1714 }
 0x389   : > { %v778_v55 = vsel %vm529_vm3, %v1715_v54, 0.0 }
 0x38a   : > { %779 = vadd.xlane.f32.xlu0 %v778_v55 }
 0x38c   : > { %v1717_v56 = vpop.eup %1716 }
 0x38d   : > { %v949_v57 = vsel %vm529_vm3, %v1717_v56, 0.0 }
 0x38e   : > { %950 = vadd.xlane.f32.xlu1 %v949_v57 }
 0x390   : > { %v1719_v58 = vpop.eup %1718 }
 0x391   : > { %v1120_v59 = vsel %vm529_vm3, %v1719_v58, 0.0 }
 0x392   : > { %1121 = vadd.xlane.f32.xlu0 %v1120_v59 }
 0x39f   : > { %954 = vrot.lane.b32.xlu1 %v2311_v20, %s1982_s16 }
 0x3a3   : > { %1125 = vrot.lane.b32.xlu1 %v2311_v20, %s1983_s2 }
 0x3a8   : > { %783 = vrot.lane.b32.xlu0 %v2311_v20, %s1984_s13  ;;  %v1597_v20 = vpack.c.bf16 %v1211_v19, %v1210_v18 }
 0x3aa   : > { %1598 = vmatpush3.bf16.msra.mxu0 %v1597_v20 }
 0x3ae   : > { %v614_v60 = vpop.xlane.xlu1 %613 }
 0x3af   : > { %1720 = vrcp.f32 %v614_v60 }
 0x3b9   : > { %v1721_v61 = vpop.eup %1720 }
 0x3ba   : > { %v616_v62 = vmul.f32 %v1721_v61, %v1713_v42 }
 0x3bc   : > { %1538 = vmatmul.mubr.msk.f32.vlgmr.msra.gmra.mrb[4].mxu1 %vm529_vm3, %v616_v62 }
 0x3bd   : > { %1547 = vmatprep.mubr.msk.f32.mxu1 %vm1976_vm0, %v1977_v1 }
 0x417   : > { %v780_v63 = vpop.xlane.xlu0 %779 }
 0x418   : > { %1722 = vrcp.f32 %v780_v63 }
 0x41b   : > { %v951_v2 = vpop.xlane.xlu1 %950 }
 0x41c   : > { %1724 = vrcp.f32 %v951_v2 }
 0x41f   : > { %v1122_v3 = vpop.xlane.xlu0 %1121  ;;  %v955_v6 = vpop.permute.xlu1 %954 }
 0x420   : > { %1726 = vrcp.f32 %v1122_v3 }
 0x422   : > { %v1723_v4 = vpop.eup %1722 }
 0x423   : > { %v782_v5 = vmul.f32 %v1723_v4, %v1715_v54  ;;  %v784_v7 = vpop.permute.xlu0 %783  ;;  %v1126_v10 = vpop.permute.xlu1 %1125 }
 0x424   : > { %1546 = vmatpush3.msra.mxu1 %v784_v7 }
 0x425   : > { %1548 = vmatmul.mubr.msk.f32.vlgmr.msra.gmra.mrb[6].mxu1 %vm529_vm3, %v782_v5  ;;  %1555 = vmatprep.subr.mxu1 %v1977_v1 }
 0x426   : > { %v1725_v8 = vpop.eup %1724  ;;  %1556 = vmatpush3.msra.mxu1 %v955_v6  ;;  %1557 = vmatprep.mubr.msk.f32.mxu1 %vm1976_vm0, %v1977_v1 }
 0x427   : > { %v953_v9 = vmul.f32 %v1725_v8, %v1717_v56  ;;  %1565 = vmatprep.subr.mxu1 %v1977_v1 }
 0x429   : > { %1558 = vmatmul.mubr.msk.f32.vlgmr.msra.gmra.mrb[8].mxu1 %vm529_vm3, %v953_v9 }
 0x42a   : > { %v1727_v11 = vpop.eup %1726  ;;  %1566 = vmatpush3.msra.mxu1 %v1126_v10  ;;  %1567 = vmatprep.mubr.msk.f32.mxu1 %vm1976_vm0, %v1977_v1 }
 0x42b   : > { %v1124_v12 = vmul.f32 %v1727_v11, %v1719_v58 }
 0x42d   : > { %1568 = vmatmul.mubr.msk.f32.vlgmr.msra.gmra.mrb[10].mxu1 %vm529_vm3, %v1124_v12 }
 0x48f   : > { %v689_v13 = vpop.f32.mrb[4].mxu1 }
 0x490   : > { %693 = vst.msk [vmem:[#allocation3] sm:$0xff] %vm529_vm3, %v689_v13  ;;  %v1539_v14 = vpop.f32.mrb[5].mxu1 }
 0x4f8   : > { %v855_v21 = vpop.f32.mrb[6].mxu1 }
 0x4f9   : > { %860 = vrot.lane.b32.xlu0 %v855_v21, %s1985_s4  ;;  %v1549_v1 = vpop.f32.mrb[7].mxu1 }
 0x4fc   : > { %v1026_v22 = vpop.f32.mrb[8].mxu1 }
 0x4fd   : > { %1031 = vrot.lane.b32.xlu1 %v1026_v22, %s1986_s14  ;;  %v1559_v23 = vpop.f32.mrb[9].mxu1 }
 0x500   : > { %v1197_v24 = vpop.f32.mrb[10].mxu1 }
 0x501   : > { %1202 = vrot.lane.b32.xlu0 %v1197_v24, %s1987_s28  ;;  %v1569_v25 = vpop.f32.mrb[11].mxu1 }
 0x56b   : > { %v861_v26 = vpop.permute.xlu0 %860 }
 0x56c   : > { %864 = vst.msk [vmem:[#allocation3] sm:$0xff] %vm863_vm4, %v861_v26 }
 0x56f   : > { %v1032_v0 = vpop.permute.xlu1 %1031 }
 0x570   : > { %1035 = vst.msk [vmem:[#allocation3] sm:$0xff] %vm1034_vm5, %v1032_v0 }
 0x573   : > { %v1203_v27 = vpop.permute.xlu0 %1202 }
 0x574   : > { %1206 = vst.msk [vmem:[#allocation3] sm:$0xff] %vm1205_vm6, %v1203_v27 }
 0x57b   : > { %v1207_v28 = vld [vmem:[#allocation3] sm:$0xff] }
 0x57c   : > { %1579 = vmatmul.mubr.msk.f32.vlgmr.msra.gmra.mrb[8].mxu0 %vm374_vm1, %v1207_v28 }
 0x64f   : > { %v1288_v30 = vpop.f32.mrb[8].mxu0 }
 0x650   : > { %v1289_v31 = vadd.f32 %v1471_v29, %v1288_v30  ;;  %v1580_v32 = vpop.f32.mrb[9].mxu0 }
 0x652   : > { %1292 = vst.msk [vmem:[%s363_s12] sm:$0xff] %vm374_vm1, %v1289_v31 }
 0x653   : > { %1885 = shalt.err (!%p1882_p5)
}
 0x654   : > { %s1886_s18 = scalar_lea.hbm %s2373_s27, 128  ;;  %s1890_s13 = scalar_lea.hbm %s2429_s6, 256 }
 0x655   : > { %p1887_p6 = scmp.ne.s32.totalorder %s2373_s27, %s1886_s18  ;;  %p1891_p12 = scmp.lt.u32.totalorder %s2373_s27, %s2429_s6 }
 0x656   : > { %p1892_p11 = scmp.lt.u32.totalorder %s1890_s13, %s1886_s18  ;;  %p1894_p0 = scmp.lt.u32.totalorder %s1886_s18, %s2373_s27 }
 0x657   : > { %p1888_p10 = pnand %p1887_p6, %p2458_p2 }
 0x658   : > { %p1893_p9 = por %p1892_p11, %p1891_p12 }
 0x659   : > { %p1889_p7 = pneg %p1888_p10 }
 0x65a   : > { %p1895_p4 = por %p1894_p0, %p1893_p9 }
 0x65c   : > { %p1896_p8 = pnand %p1895_p4, %p1889_p7 }
 0x65e   : > { %1899 = shalt.err (!%p1896_p8)
}
 0x65f   : > { %1615 = dma.vmem_to_hbm [thread:$0]  (%p2458_p2), %s2375_s7, 128, %s2373_s27, %s1294_s29  }
 0x660 PF: > { %s2459_s28 = sld [smem:[#allocation19_spill]]  ;;  %s2460_s11 = sld [smem:[#allocation20_spill]] }
 0x661   : > { %p2462_p13 = scmp.ge.s32.totalorder %s1966_s26, 2 }
 0x666   : > { %s1320_s17 = sand.u32 1, %s2459_s28   ;;  %p2461_p1 = scmp.ne.s32.totalorder %s2460_s11, 0 }
 0x667   : > { %s1321_s8 = scalar_lea.sflag [#allocation6], %s1320_s17 }
 0x668   : > { %p1635_p3 = pnand %p2462_p13, %p2461_p1 }
 0x66a   : > { %1941 = dma.done.wait (!%p1635_p3), %s1321_s8, 128  }
 0x66b   : > { %1943 = vsyncadd (!%p1635_p3), %s1321_s8, 4294967168  ;;  %s26_s26 = sadd.s32 1, %s1966_s26   ;;  %s2463_s21 = smov %s1950_s22 }
 0x66c   : > { %p23_p5 = scmp.ge.s32.totalorder %s26_s26, 4   ;;  %s2464_s22 = smov %s1954_s23 }
 0x66d   : > { %s2465_s23 = smov %s2194_s15  ;;  %s2466_s24 = smov %s1962_s25 }
 0x66e   : > { %s2467_s25 = smov %s2469_s10  ;;  %25 = sbr.rel (!%p23_p5) target bundleno = 13 (0xd), region = 118 }
 0x675   :  { %1326 = vsyncpa [#allocation5], 1 }
 0x676   :  { %1328 = vsyncpa [#allocation5 + $0x1], 1 }
 0x677   :  { %1329 = vsyncpa [#allocation8], 1 }
 0x678   :  { %1331 = vsyncpa [#allocation8 + $0x1], 1 }
 0x679   :  { %1332 = vsyncpa [#allocation11], 1 }
 0x67a   :  { %1333 = vsyncpa [#allocation6], 1 }
 0x67b   :  { %1335 = vsyncpa [#allocation6 + $0x1], 1 }

</bundles_post_ra>
